<compile_context>
chip_gen: v6e
topology: v6e:2x2x1
jax: 0.10.0
libtpu: 0.0.40
codegen_flags: <defaults>
</compile_context>

<pallas_src>
import jax
import jax.numpy as jnp
from jax import lax
from jax.experimental import pallas as pl
from jax.experimental.pallas import tpu as pltpu

HIDDEN = 256
# Packed parameter slab layout, shape (16, HIDDEN) float32 (lane-dense, 16 KB):
#   rows 0..3 : W1 (in=4, out=256)                      layer-1 weights
#   row  4    : b1 (256,)                               layer-1 bias
#   row  5    : lanes 0..2 = [bv, ba0, ba1]             head biases
#   rows 6..7 : zeros (padding)
#   rows 8..15: row 8 = wv^T, rows 9..10 = wa^T, rows 11..15 zeros
#               (head weights, transposed -> contraction along lanes)
SLAB_ROWS = 16

_NT_DIMS = (((1,), (1,)), ((), ()))   # contract lhs dim 1 with rhs dim 1


def dqn_kernel(x_ref, p_ref, out_ref):
    x = x_ref[...]                                  # (B, 4)      f32
    p = p_ref[...]                                  # (16, 256)   f32

    # ---- Layer 1 on the VPU: K=4 contraction as 4 broadcast FMAs ----------
    h = p[4:5, :]                                   # b1, broadcasts over B
    h = h + x[:, 0:1] * p[0:1, :]
    h = h + x[:, 1:2] * p[1:2, :]
    h = h + x[:, 2:3] * p[2:3, :]
    h = h + x[:, 3:4] * p[3:4, :]
    h = jnp.maximum(h, 0.0)                         # (B, 256) ReLU

    # ---- Fused heads: one MXU matmul with a lane-major (transposed) RHS ---
    # rhs rows: [wv; wa0; wa1; 0 ...]; contraction runs over the 256 lanes.
    wt = p[8:16, :]                                 # (8, 256), rows 3..7 zero
    heads = lax.dot_general(h, wt, _NT_DIMS,
                            preferred_element_type=jnp.float32)   # (B, 8)
    heads = heads[:, 0:3] + p[5:6, 0:3]             # + [bv, ba0, ba1] -> (B, 3)

    value = heads[:, 0:1]                           # (B, 1)
    adv = heads[:, 1:3]                             # (B, 2)

    # global adv.mean() over all B*2 elements: a single XLU reduce.
    adv_mean = jnp.sum(adv) * (1.0 / (adv.shape[0] * adv.shape[1]))

    out_ref[...] = adv + (value - adv_mean)         # (B, 2)


def pack_params(w1, b1, wv, bv, wa, ba):
    """Pack all parameters into one lane-dense (16, 256) f32 slab.

    Call ONCE whenever the parameters change — NOT per forward call.
    w1: (4,256); b1: (1,256); wv: (256,1); bv: (1,1); wa: (256,2); ba: (1,2)
    (weights stored (in, out), i.e. transposed relative to torch.nn.Linear).
    """
    slab = jnp.zeros((SLAB_ROWS, HIDDEN), jnp.float32)
    slab = slab.at[0:4, :].set(w1.astype(jnp.float32))
    slab = slab.at[4, :].set(b1.reshape(HIDDEN).astype(jnp.float32))
    slab = slab.at[5, 0:1].set(bv.reshape(1).astype(jnp.float32))
    slab = slab.at[5, 1:3].set(ba.reshape(2).astype(jnp.float32))
    slab = slab.at[8, :].set(wv.reshape(HIDDEN).astype(jnp.float32))
    slab = slab.at[9:11, :].set(wa.T.astype(jnp.float32))
    return slab


def dueling_dqn_forward(x, params_slab):
    """x: (B, 4) f32 observations; params_slab: (16, 256) from pack_params().
    Returns (B, 2) Q-values."""
    # TODO(synk): if this head is ever run at replay-buffer batch sizes, add a
    # batch grid axis (block (TB, ...) with TB a multiple of 8, marked
    # dimension_semantics=("parallel",) so v7x's 2nd TensorCore is used) with a
    # two-pass / accumulated global adv.mean(), and optionally cast h / head
    # weights to bf16 for the MXU on v6e/v7x.
    B = x.shape[0]
    vmem = pl.BlockSpec(memory_space=pltpu.MemorySpace.VMEM)
    return pl.pallas_call(
        dqn_kernel,
        out_shape=jax.ShapeDtypeStruct((B, 2), jnp.float32),
        in_specs=[vmem, vmem],
        out_specs=vmem,
    )(x, params_slab)


def xavier_uniform(key, fan_in, fan_out):
    # matches torch.nn.init.xavier_uniform_ (gain=1) for a (fan_out, fan_in)
    # weight; we directly build the transposed (fan_in, fan_out) array.
    limit = jnp.sqrt(6.0 / (fan_in + fan_out))
    return jax.random.uniform(
        key, (fan_in, fan_out), dtype=jnp.float32, minval=-limit, maxval=limit
    )


if __name__ == "__main__":
    key = jax.random.PRNGKey(0)
    k_x, k_w1, k_wv, k_wa = jax.random.split(key, 4)

    B = 8  # small batch of CartPole observations

    # deterministic parameters (xavier-uniform weights, zero biases — matches
    # the module's init_weights)
    w1 = xavier_uniform(k_w1, 4, 256)          # (4, 256)
    b1 = jnp.zeros((1, 256), jnp.float32)
    wv = xavier_uniform(k_wv, 256, 1)          # (256, 1)
    bv = jnp.zeros((1, 1), jnp.float32)
    wa = xavier_uniform(k_wa, 256, 2)          # (256, 2)
    ba = jnp.zeros((1, 2), jnp.float32)

    # example input: CartPole observations, shape (B, 4)
    x = jax.random.normal(k_x, (B, 4), dtype=jnp.float32)

    # pack once (per parameter update); reused across all forward calls
    slab = jax.block_until_ready(pack_params(w1, b1, wv, bv, wa, ba))

    out = dueling_dqn_forward(x, slab)
    out = jax.block_until_ready(out)

    # sanity check against pure-JAX reference (original un-fused math)
    h_ref = jnp.maximum(x @ w1 + b1, 0.0)
    v_ref = h_ref @ wv + bv
    a_ref = h_ref @ wa + ba
    ref = a_ref + v_ref - jnp.mean(a_ref)
    assert out.shape == (B, 2)
    assert jnp.allclose(out, ref, atol=1e-5, rtol=1e-5)

    print("KERNEL_OK")
</pallas_src>

<mosaic_0001>
module attributes {stable_mosaic.version = 11 : i64} {
  func.func @dqn_kernel(%arg0: memref<8x4xf32, #tpu.memory_space<vmem>>, %arg1: memref<16x256xf32, #tpu.memory_space<vmem>>, %arg2: memref<8x2xf32, #tpu.memory_space<vmem>>) attributes {dimension_semantics = [], scalar_prefetch = 0 : i64, scratch_operands = 0 : i64, tpu.core_type = #tpu.core_type<tc>} {
    %c0 = arith.constant 0 : index
    %c0_0 = arith.constant 0 : index
    %0 = vector.load %arg0[%c0, %c0_0] : memref<8x4xf32, #tpu.memory_space<vmem>>, vector<8x4xf32>
    %c0_1 = arith.constant 0 : index
    %c0_2 = arith.constant 0 : index
    %1 = vector.load %arg1[%c0_1, %c0_2] : memref<16x256xf32, #tpu.memory_space<vmem>>, vector<16x256xf32>
    %2 = vector.extract_strided_slice %1 {offsets = [4, 0], sizes = [1, 256], strides = [1, 1]} : vector<16x256xf32> to vector<1x256xf32>
    %3 = vector.extract_strided_slice %0 {offsets = [0, 0], sizes = [8, 1], strides = [1, 1]} : vector<8x4xf32> to vector<8x1xf32>
    %4 = vector.extract_strided_slice %1 {offsets = [0, 0], sizes = [1, 256], strides = [1, 1]} : vector<16x256xf32> to vector<1x256xf32>
    %5 = vector.broadcast %3 : vector<8x1xf32> to vector<8x256xf32>
    %6 = vector.broadcast %4 : vector<1x256xf32> to vector<8x256xf32>
    %7 = arith.mulf %5, %6 : vector<8x256xf32>
    %8 = vector.broadcast %2 : vector<1x256xf32> to vector<8x256xf32>
    %9 = arith.addf %8, %7 : vector<8x256xf32>
    %10 = vector.extract_strided_slice %0 {offsets = [0, 1], sizes = [8, 1], strides = [1, 1]} : vector<8x4xf32> to vector<8x1xf32>
    %11 = vector.extract_strided_slice %1 {offsets = [1, 0], sizes = [1, 256], strides = [1, 1]} : vector<16x256xf32> to vector<1x256xf32>
    %12 = vector.broadcast %10 : vector<8x1xf32> to vector<8x256xf32>
    %13 = vector.broadcast %11 : vector<1x256xf32> to vector<8x256xf32>
    %14 = arith.mulf %12, %13 : vector<8x256xf32>
    %15 = arith.addf %9, %14 : vector<8x256xf32>
    %16 = vector.extract_strided_slice %0 {offsets = [0, 2], sizes = [8, 1], strides = [1, 1]} : vector<8x4xf32> to vector<8x1xf32>
    %17 = vector.extract_strided_slice %1 {offsets = [2, 0], sizes = [1, 256], strides = [1, 1]} : vector<16x256xf32> to vector<1x256xf32>
    %18 = vector.broadcast %16 : vector<8x1xf32> to vector<8x256xf32>
    %19 = vector.broadcast %17 : vector<1x256xf32> to vector<8x256xf32>
    %20 = arith.mulf %18, %19 : vector<8x256xf32>
    %21 = arith.addf %15, %20 : vector<8x256xf32>
    %22 = vector.extract_strided_slice %0 {offsets = [0, 3], sizes = [8, 1], strides = [1, 1]} : vector<8x4xf32> to vector<8x1xf32>
    %23 = vector.extract_strided_slice %1 {offsets = [3, 0], sizes = [1, 256], strides = [1, 1]} : vector<16x256xf32> to vector<1x256xf32>
    %24 = vector.broadcast %22 : vector<8x1xf32> to vector<8x256xf32>
    %25 = vector.broadcast %23 : vector<1x256xf32> to vector<8x256xf32>
    %26 = arith.mulf %24, %25 : vector<8x256xf32>
    %27 = arith.addf %21, %26 : vector<8x256xf32>
    %cst = arith.constant 0.000000e+00 : f32
    %28 = vector.broadcast %cst : f32 to vector<8x256xf32>
    %29 = arith.maximumf %27, %28 : vector<8x256xf32>
    %30 = vector.extract_strided_slice %1 {offsets = [8, 0], sizes = [8, 256], strides = [1, 1]} : vector<16x256xf32> to vector<8x256xf32>
    %cst_3 = arith.constant dense<0.000000e+00> : vector<8x8xf32>
    %31 = tpu.matmul %29, %30, %cst_3 {dimension_numbers = #tpu.dot_dimension_numbers<[1], [1], [0], [0], [0, 0, 1, 0], [], []>} : vector<8x256xf32>, vector<8x256xf32>, vector<8x8xf32> -> vector<8x8xf32>
    %32 = vector.extract_strided_slice %31 {offsets = [0, 0], sizes = [8, 3], strides = [1, 1]} : vector<8x8xf32> to vector<8x3xf32>
    %33 = vector.extract_strided_slice %1 {offsets = [5, 0], sizes = [1, 3], strides = [1, 1]} : vector<16x256xf32> to vector<1x3xf32>
    %34 = vector.broadcast %33 : vector<1x3xf32> to vector<8x3xf32>
    %35 = arith.addf %32, %34 : vector<8x3xf32>
    %36 = vector.extract_strided_slice %35 {offsets = [0, 0], sizes = [8, 1], strides = [1, 1]} : vector<8x3xf32> to vector<8x1xf32>
    %37 = vector.extract_strided_slice %35 {offsets = [0, 1], sizes = [8, 2], strides = [1, 1]} : vector<8x3xf32> to vector<8x2xf32>
    %38 = vector.shape_cast %37 : vector<8x2xf32> to vector<1x8x2xf32>
    %cst_4 = arith.constant dense<0.000000e+00> : vector<1xf32>
    %39 = vector.multi_reduction <add>, %38, %cst_4 [1, 2] : vector<1x8x2xf32> to vector<1xf32>
    %40 = vector.shape_cast %39 : vector<1xf32> to vector<1x1x1xf32>
    %41 = vector.extract %40[0, 0, 0] : f32 from vector<1x1x1xf32>
    %cst_5 = arith.constant 6.250000e-02 : f32
    %42 = arith.mulf %41, %cst_5 : f32
    %43 = vector.broadcast %42 : f32 to vector<8x1xf32>
    %44 = arith.subf %36, %43 : vector<8x1xf32>
    %45 = vector.broadcast %44 : vector<8x1xf32> to vector<8x2xf32>
    %46 = arith.addf %37, %45 : vector<8x2xf32>
    %c0_6 = arith.constant 0 : index
    %c0_7 = arith.constant 0 : index
    %47 = vector.load %arg2[%c0_6, %c0_7] : memref<8x2xf32, #tpu.memory_space<vmem>>, vector<8x2xf32>
    tpu.vector_store %arg2[%c0_6, %c0_7], %46 {strides = array<i32>} : memref<8x2xf32, #tpu.memory_space<vmem>>, vector<8x2xf32>,
    return
  }
}

</mosaic_0001>

<bundles_post_ra>
// kernel: tpu_custom_call.1
= control target key start
LH: loop header
LB: loop body
LE: loop exit
PB: predicated region body
PF: predicated region fallthrough
CT: control target
= control target key end

     0   :  { %7 = vsyncpa [#allocation3], 0  ;;  %s252_s9 = smov [#allocation2]   ;;  %s286_s0 = inlined_call_operand.vmem [shape: f32[8,4], index: 0, kind: input, shape index: {}]   ;;  %s287_s1 = inlined_call_operand.hbm [shape: f32[16,256], index: 1, kind: input, shape index: {}]   ;;  %s288_s2 = inlined_call_operand.vmem [shape: f32[8,2], index: 2, kind: output, shape index: {}]  }
   0x1   :  { %s15_s10 = sshll.u32 %s252_s9, 4  ;;  %s16_s10 = int_to_ptr.vmem [resolvable:$true] %s15_s10 }
   0x2   :  { %s238_s11 = scalar_lea.vmem %s16_s10, 512  ;;  %p243_p1 = scmp.lt.s32.totalorder %s16_s10, %s16_s10 }
   0x3   :  { %p239_p0 = scmp.ne.s32.totalorder %s16_s10, %s238_s11  ;;  %p244_p2 = scmp.lt.s32.totalorder %s238_s11, %s238_s11 }
   0x5   :  { %p245_p3 = por %p244_p2, %p243_p1 }
   0x7   :  { %p246_p4 = pnand %p245_p3, %p239_p0 }
   0x9   :  { %249 = shalt.err (!%p246_p4)
}
   0xa   :  { %s253_s12 = smov 256   ;;  %s254_s13 = smov 16  }
   0xb   :  { %21 = dma.hbm_to_vmem [thread:$0]  %s287_s1, 512, %s16_s10, [#allocation3], %s253_s12, %s253_s12, %s254_s13  }
   0xc   :  { %250 = dma.done.wait [#allocation3], 512  }
   0xd   :  { %251 = vsyncadd [#allocation3], 4294966784  ;;  %v255_v0 = vmov 0   ;;  %v256_v1 = vmov 2   ;;  %v25_v2 = vld [vmem:[%s286_s0] sm:$0xff]  ;;  %v257_v3 = vmov 1   ;;  %v35_v7 = vlaneseq }
   0xe   :  { %224 = vset.pattern.permute.xlu0 %v255_v0  ;;  %226 = vset.pattern.permute.xlu1 %v256_v1  ;;  %v258_v4 = vmov 3   ;;  %v29_v5 = vld [vmem:[#allocation2 + $0x18] sm:$0xff]  ;;  %v28_v6 = vld [vmem:[#allocation2 + $0x10] sm:$0xff]  ;;  %v26_v10 = vld [vmem:[#allocation2] sm:$0xff]  ;;  %s259_s0 = smov 127   ;;  %vm184_vm0 = vcmask 15360  }
   0xf   :  { %32 = vperm.xlu0 %224, %v25_v2   ;;  %72 = vperm.xlu1 %226, %v25_v2   ;;  %v36_v8 = vshrl.u32 %v35_v7, 7  ;;  %v27_v11 = vld [vmem:[#allocation2 + $0x8] sm:$0xff] }
  0x10   :  { %135 = vmatprep.subr.mxu0 %v29_v5 }
  0x11   :  { %136 = vmatpush1.xpose.msra.mxu0 %v28_v6  ;;  %v37_v9 = vsub.s32 0, %v36_v8  ;;  %v47_v12 = vsub.s32 4, %v36_v8  ;;  %v61_v15 = vsub.s32 1, %v36_v8  ;;  %v77_v16 = vsub.s32 2, %v36_v8 }
  0x12   :  { %v93_v19 = vsub.s32 3, %v36_v8  ;;  %v177_v48 = vsub.s32 5, %v36_v8 }
  0x13   :  { %225 = vset.pattern.permute.xlu0 %v257_v3  ;;  %227 = vset.pattern.permute.xlu1 %v258_v4  ;;  %v38_v13 = vrot.slane %v26_v10, %v37_v9  ;;  %v42_v14 = vrot.slane %v27_v11, %v37_v9  ;;  %v48_v20 = vrot.slane %v26_v10, %v47_v12 }
  0x14   :  { %56 = vperm.xlu0 %225, %v25_v2   ;;  %88 = vperm.xlu1 %227, %v25_v2   ;;  %v52_v21 = vrot.slane %v27_v11, %v47_v12  ;;  %v62_v24 = vrot.slane %v26_v10, %v61_v15  ;;  %v66_v25 = vrot.slane %v27_v11, %v61_v15 }
  0x15   :  { %v78_v26 = vrot.slane %v26_v10, %v77_v16  ;;  %v82_v27 = vrot.slane %v27_v11, %v77_v16  ;;  %v94_v28 = vrot.slane %v26_v10, %v93_v19  ;;  %v98_v29 = vrot.slane %v27_v11, %v93_v19 }
  0x16   :  { %v178_v49 = vrot.slane %v26_v10, %v177_v48 }
  0x18   :  { %228 = vset.pattern.permute.xlu1 %v255_v0  ;;  %229 = vset.pattern.permute.xlu0 %v255_v0 }
  0x8a   :  { %v33_v17 = vpop.permute.xlu0 %32  ;;  %v73_v18 = vpop.permute.xlu1 %72 }
  0x8b   :  { %v43_v22 = vmul.f32 %v38_v13, %v33_v17  ;;  %v44_v23 = vmul.f32 %v42_v14, %v33_v17  ;;  %v83_v36 = vmul.f32 %v78_v26, %v73_v18  ;;  %v84_v37 = vmul.f32 %v82_v27, %v73_v18 }
  0x8d   :  { %v53_v32 = vadd.f32 %v48_v20, %v43_v22  ;;  %v54_v33 = vadd.f32 %v52_v21, %v44_v23 }
  0x8f   :  { %v57_v30 = vpop.permute.xlu0 %56  ;;  %v89_v31 = vpop.permute.xlu1 %88 }
  0x90   :  { %v67_v34 = vmul.f32 %v62_v24, %v57_v30  ;;  %v68_v35 = vmul.f32 %v66_v25, %v57_v30  ;;  %v99_v40 = vmul.f32 %v94_v28, %v89_v31  ;;  %v100_v41 = vmul.f32 %v98_v29, %v89_v31 }
  0x92   :  { %v69_v38 = vadd.f32 %v67_v34, %v53_v32  ;;  %v70_v39 = vadd.f32 %v68_v35, %v54_v33 }
  0x94   :  { %v85_v42 = vadd.f32 %v83_v36, %v69_v38  ;;  %v86_v43 = vadd.f32 %v84_v37, %v70_v39 }
  0x96   :  { %v101_v44 = vadd.f32 %v99_v40, %v85_v42  ;;  %v102_v45 = vadd.f32 %v100_v41, %v86_v43 }
  0x98   :  { %v104_v46 = vmax.f32 %v102_v45, 0.0  ;;  %v103_v47 = vmax.f32 %v101_v44, 0.0 }
  0x9a   :  { %169 = vmatprep.mubr.f32.mxu0 %v104_v46 }
  0x9b   :  { %170 = vmatmul.mubr.f32.vlgmr.msra.gmra.mxu0 %v103_v47 }
 0x15b   :  { %v171_v50 = vpop.f32.mrf.mxu0 }
 0x15c   :  { %v179_v51 = vadd.f32 %v178_v49, %v171_v50 }
 0x15d   :  { %v173_v52 = vpop.f32.mrf.mxu0 }
 0x15e   :  { %181 = vrot.lane.b32.xlu1 %v179_v51, %s259_s0 }
 0x1d0   :  { %v182_v53 = vpop.permute.xlu1 %181 }
 0x1d1   :  { %v185_v54 = vsel %vm184_vm0, %v182_v53, 0.0 }
 0x1d2   :  { %186 = vadd.xlane.f32.xlu0 %v185_v54 }
 0x25b   :  { %v187_v55 = vpop.xlane.xlu0 %186 }
 0x25c   :  { %v188_v56 = vrot.slane %v187_v55, 4 }
 0x25e   :  { %v189_v57 = vadd.f32 %v188_v56, %v187_v55 }
 0x260   :  { %v190_v58 = vrot.slane %v189_v57, 2 }
 0x262   :  { %v191_v59 = vadd.f32 %v190_v58, %v189_v57 }
 0x264   :  { %v192_v60 = vrot.slane %v191_v59, 1 }
 0x266   :  { %v193_v61 = vadd.f32 %v192_v60, %v191_v59 }
 0x268   :  { %214 = vpush %v193_v61 }
 0x299   :  { %s215_s1 = spop %214 }
 0x29a   :  { %s195_s18 = smul.f32 0.0625, %s215_s1 }
 0x29c   :  { %v196_v62 = vstv %s195_s18 }
 0x29d   :  { %v197_v63 = vsub.f32 %v179_v51, %v196_v62 }
 0x29f   :  { %200 = vperm.xlu1 %228, %v197_v63  }
 0x31a   :  { %v201_v0 = vpop.permute.xlu1 %200 }
 0x31b   :  { %v203_v1 = vadd.f32 %v201_v0, %v179_v51 }
 0x31d   :  { %205 = vrot.lane.b32.xlu1 %v203_v1, %s259_s0 }
 0x38f   :  { %v206_v2 = vpop.permute.xlu1 %205 }
 0x390   :  { %208 = vst.msk [vmem:[%s288_s2] sm:$0xff] %vm184_vm0, %v206_v2 }
 0x391   :  { %213 = vsyncpa [#allocation3], 1 }

</bundles_post_ra>
